<compile_context>
chip_gen: v6e
topology: v6e:2x2x1
jax: 0.10.0
libtpu: 0.0.40
codegen_flags: <defaults>
</compile_context>

<pallas_src>
import jax
import jax.numpy as jnp
from jax.experimental import pallas as pl
from jax.experimental.pallas import tpu as pltpu

_LANE = 128      # lane width of a vreg
_SUBLANE = 8     # sublane count of a vreg


def _mlp_kernel(x_ref, w1_ref, w2_ref, o_ref):
    # Layer 1 (bias folded): h[:, :hidden] = x @ W1 + b1, h[:, hidden] == 1.
    h = jnp.dot(x_ref[...], w1_ref[...], preferred_element_type=jnp.float32)
    # Layer 2 (b2 folded as last row of augmented W2); lane-dense padded output.
    o_ref[...] = jnp.dot(
        h, w2_ref[...], preferred_element_type=jnp.float32
    ).astype(o_ref.dtype)


def _round_up(n, m):
    return ((n + m - 1) // m) * m


def regression_forward(x, w1, b1, w2, b2, *, block_b=512):
    """Regression.forward: linear2(linear1(x)), no activation.

    x : (B, input_size) float32
    w1: (input_size, hidden), b1: (hidden,)
    w2: (hidden, num_classes), b2: (num_classes,)
    returns (B, num_classes) float32
    """
    B, input_size = x.shape
    hidden = w1.shape[1]
    num_classes = w2.shape[1]

    k1 = input_size + 1           # augmented contraction dim of layer 1
    k2 = hidden + 1               # augmented contraction dim of layer 2
    n_pad = _round_up(num_classes, _LANE)   # lane-dense output width

    # --- fold biases into augmented operands (5 operands -> 3) -------------
    x_aug = jnp.concatenate([x, jnp.ones((B, 1), x.dtype)], axis=1)

    w1_aug = jnp.zeros((k1, k2), jnp.float32)
    w1_aug = w1_aug.at[:input_size, :hidden].set(w1)
    w1_aug = w1_aug.at[input_size, :hidden].set(b1)
    w1_aug = w1_aug.at[input_size, hidden].set(1.0)   # carries the "1" into h

    w2_aug = jnp.zeros((k2, n_pad), jnp.float32)
    w2_aug = w2_aug.at[:hidden, :num_classes].set(w2)
    w2_aug = w2_aug.at[hidden, :num_classes].set(b2)

    # --- batch tiling: 1-D parallel grid, blocks are multiples of 8 rows ---
    # block_b sized well under v7x's ~32 MiB scoped VMEM even double-buffered:
    # 2 * block_b * (k1 + n_pad) * 4B  (~0.6 MiB at block_b=512).
    tb = _round_up(min(block_b, _round_up(B, _SUBLANE)), _SUBLANE)
    b_pad = _round_up(B, tb)
    if b_pad != B:
        x_aug = jnp.pad(x_aug, ((0, b_pad - B), (0, 0)))
    grid = (b_pad // tb,)

    flops = 2 * b_pad * (k1 * k2 + k2 * n_pad)
    bytes_accessed = 4 * (b_pad * k1 + k1 * k2 + k2 * n_pad + b_pad * n_pad)

    out_padded = pl.pallas_call(
        _mlp_kernel,
        out_shape=jax.ShapeDtypeStruct((b_pad, n_pad), jnp.float32),
        grid=grid,
        in_specs=[
            pl.BlockSpec((tb, k1), lambda i: (i, 0),
                         memory_space=pltpu.MemorySpace.VMEM),
            pl.BlockSpec((k1, k2), lambda i: (0, 0),
                         memory_space=pltpu.MemorySpace.VMEM),
            pl.BlockSpec((k2, n_pad), lambda i: (0, 0),
                         memory_space=pltpu.MemorySpace.VMEM),
        ],
        out_specs=pl.BlockSpec((tb, n_pad), lambda i: (i, 0),
                               memory_space=pltpu.MemorySpace.VMEM),
        compiler_params=pltpu.CompilerParams(
            dimension_semantics=("parallel",)),
        cost_estimate=pl.CostEstimate(flops=flops,
                                      transcendentals=0,
                                      bytes_accessed=bytes_accessed),
    )(x_aug, w1_aug, w2_aug)

    # Strip batch padding and the lane padding of the output.
    return out_padded[:B, :num_classes]


def init_regression_params(key, input_size, hidden, num_classes):
    """nn.Linear-style init: U(-1/sqrt(fan_in), 1/sqrt(fan_in)), weights stored (in, out)."""
    k1, k2, k3, k4 = jax.random.split(key, 4)
    bound1 = 1.0 / jnp.sqrt(input_size)
    bound2 = 1.0 / jnp.sqrt(hidden)
    w1 = jax.random.uniform(k1, (input_size, hidden), jnp.float32, -bound1, bound1)
    b1 = jax.random.uniform(k2, (hidden,), jnp.float32, -bound1, bound1)
    w2 = jax.random.uniform(k3, (hidden, num_classes), jnp.float32, -bound2, bound2)
    b2 = jax.random.uniform(k4, (num_classes,), jnp.float32, -bound2, bound2)
    return w1, b1, w2, b2


if __name__ == "__main__":
    batch, input_size, hidden, num_classes = 8, 16, 32, 4

    key = jax.random.PRNGKey(0)
    kx, kp = jax.random.split(key)
    x = jax.random.normal(kx, (batch, input_size), jnp.float32)
    w1, b1, w2, b2 = init_regression_params(kp, input_size, hidden, num_classes)

    out = regression_forward(x, w1, b1, w2, b2)
    out = jax.block_until_ready(out)

    # Sanity check against plain-JAX reference of the PyTorch forward.
    ref = (x @ w1 + b1) @ w2 + b2
    assert out.shape == (batch, num_classes)
    assert jnp.allclose(out, ref, atol=1e-5, rtol=1e-5)

    print("KERNEL_OK")
</pallas_src>

<mosaic_0001>
module attributes {stable_mosaic.version = 11 : i64} {
  func.func @_mlp_kernel(%arg0: i32, %arg1: memref<8x17xf32, #tpu.memory_space<vmem>>, %arg2: memref<17x33xf32, #tpu.memory_space<vmem>>, %arg3: memref<33x128xf32, #tpu.memory_space<vmem>>, %arg4: memref<8x128xf32, #tpu.memory_space<vmem>>) attributes {dimension_semantics = [#tpu.dimension_semantics<parallel>], iteration_bounds = array<i64: 1>, scalar_prefetch = 0 : i64, scratch_operands = 0 : i64, tpu.core_type = #tpu.core_type<tc>, window_params = [{transform_indices = @transform_0, window_bounds = array<i64: 8, 17>}, {pipeline_mode = #tpu.pipeline_mode<synchronous>, transform_indices = @transform_1, window_bounds = array<i64: 17, 33>}, {pipeline_mode = #tpu.pipeline_mode<synchronous>, transform_indices = @transform_2, window_bounds = array<i64: 33, 128>}, {transform_indices = @transform_3, window_bounds = array<i64: 8, 128>}]} {
    %c0 = arith.constant 0 : index
    %c0_0 = arith.constant 0 : index
    %0 = vector.load %arg1[%c0, %c0_0] : memref<8x17xf32, #tpu.memory_space<vmem>>, vector<8x17xf32>
    %c0_1 = arith.constant 0 : index
    %c0_2 = arith.constant 0 : index
    %1 = vector.load %arg2[%c0_1, %c0_2] : memref<17x33xf32, #tpu.memory_space<vmem>>, vector<17x33xf32>
    %cst = arith.constant dense<0.000000e+00> : vector<8x33xf32>
    %2 = tpu.matmul %0, %1, %cst {dimension_numbers = #tpu.dot_dimension_numbers<[1], [0], [0], [1], [0, 0, 1, 1], [], []>} : vector<8x17xf32>, vector<17x33xf32>, vector<8x33xf32> -> vector<8x33xf32>
    %c0_3 = arith.constant 0 : index
    %c0_4 = arith.constant 0 : index
    %3 = vector.load %arg3[%c0_3, %c0_4] : memref<33x128xf32, #tpu.memory_space<vmem>>, vector<33x128xf32>
    %cst_5 = arith.constant dense<0.000000e+00> : vector<8x128xf32>
    %4 = tpu.matmul %2, %3, %cst_5 {dimension_numbers = #tpu.dot_dimension_numbers<[1], [0], [0], [1], [0, 0, 1, 1], [], []>} : vector<8x33xf32>, vector<33x128xf32>, vector<8x128xf32> -> vector<8x128xf32>
    %c0_6 = arith.constant 0 : index
    %c0_7 = arith.constant 0 : index
    %5 = vector.load %arg4[%c0_6, %c0_7] : memref<8x128xf32, #tpu.memory_space<vmem>>, vector<8x128xf32>
    tpu.vector_store %arg4[%c0_6, %c0_7], %4 {strides = array<i32>} : memref<8x128xf32, #tpu.memory_space<vmem>>, vector<8x128xf32>,
    return
  }
  func.func @transform_0(%arg0: i32) -> (i32, i32) {
    %c0_i32 = arith.constant 0 : i32
    %c0_i32_0 = arith.constant 0 : i32
    return %arg0, %c0_i32 : i32, i32
  }
  func.func @transform_1(%arg0: i32) -> (i32, i32) {
    %c0_i32 = arith.constant 0 : i32
    %c0_i32_0 = arith.constant 0 : i32
    %c0_i32_1 = arith.constant 0 : i32
    return %c0_i32, %c0_i32_0 : i32, i32
  }
  func.func @transform_2(%arg0: i32) -> (i32, i32) {
    %c0_i32 = arith.constant 0 : i32
    %c0_i32_0 = arith.constant 0 : i32
    %c0_i32_1 = arith.constant 0 : i32
    return %c0_i32, %c0_i32_0 : i32, i32
  }
  func.func @transform_3(%arg0: i32) -> (i32, i32) {
    %c0_i32 = arith.constant 0 : i32
    %c0_i32_0 = arith.constant 0 : i32
    return %arg0, %c0_i32 : i32, i32
  }
}

</mosaic_0001>

<bundles_post_ra>
// kernel: tpu_custom_call.1
= control target key start
LH: loop header
LB: loop body
LE: loop exit
PB: predicated region body
PF: predicated region fallthrough
CT: control target
= control target key end

     0   :  { %8 = vsyncpa [#allocation3], 0  ;;  %s405_s0 = inlined_call_operand.hbm [shape: f32[8,17], index: 0, kind: input, shape index: {}]   ;;  %s406_s1 = inlined_call_operand.hbm [shape: f32[17,33], index: 1, kind: input, shape index: {}]   ;;  %s407_s2 = inlined_call_operand.hbm [shape: f32[33,128], index: 2, kind: input, shape index: {}]   ;;  %s408_s3 = inlined_call_operand.hbm [shape: f32[8,128], index: 3, kind: output, shape index: {}]  }
   0x1   :  { %9 = vsyncpa [#allocation6], 0 }
   0x2   :  { %10 = vsyncpa [#allocation4], 0  ;;  %s365_s12 = smov [#allocation5]  }
   0x3   :  { %s26_s13 = sshll.u32 %s365_s12, 4  ;;  %s27_s13 = int_to_ptr.vmem [resolvable:$true] %s26_s13 }
   0x4   :  { %s287_s14 = scalar_lea.vmem %s27_s13, 384  ;;  %p292_p1 = scmp.lt.s32.totalorder %s27_s13, %s27_s13 }
   0x5   :  { %p288_p0 = scmp.ne.s32.totalorder %s27_s13, %s287_s14  ;;  %p293_p2 = scmp.lt.s32.totalorder %s287_s14, %s287_s14 }
   0x7   :  { %p294_p3 = por %p293_p2, %p292_p1 }
   0x9   :  { %p295_p4 = pnand %p294_p3, %p288_p0 }
   0xb   :  { %298 = shalt.err (!%p295_p4)
}
   0xc   :  { %s366_s15 = smov 128   ;;  %s367_s16 = smov 8  }
   0xd   :  { %32 = dma.hbm_to_vmem [thread:$0]  %s406_s1, 384, %s27_s13, [#allocation6], %s366_s15, %s366_s15, %s367_s16  }
   0xe   :  { %s368_s19 = smov [#allocation2]   ;;  %s369_s21 = smov [#allocation7]  }
   0xf   :  { %s17_s20 = sshll.u32 %s368_s19, 4  ;;  %s38_s22 = sshll.u32 %s369_s21, 4  ;;  %s18_s20 = int_to_ptr.vmem [resolvable:$true] %s17_s20  ;;  %s39_s22 = int_to_ptr.vmem [resolvable:$true] %s38_s22 }
  0x10   :  { %s307_s23 = scalar_lea.vmem %s18_s20, 128  ;;  %p312_p6 = scmp.lt.s32.totalorder %s18_s20, %s18_s20 }
  0x11   :  { %p308_p5 = scmp.ne.s32.totalorder %s18_s20, %s307_s23  ;;  %p313_p7 = scmp.lt.s32.totalorder %s307_s23, %s307_s23 }
  0x13   :  { %p314_p8 = por %p313_p7, %p312_p6 }
  0x15   :  { %p315_p9 = pnand %p314_p8, %p308_p5 }
  0x17   :  { %318 = shalt.err (!%p315_p9)
}
  0x18   :  { %20 = dma.hbm_to_vmem [thread:$0]  %s405_s0, 128, %s18_s20, [#allocation3]  }
  0x19   :  { %s327_s26 = scalar_lea.vmem %s39_s22, 640  ;;  %p332_p11 = scmp.lt.s32.totalorder %s39_s22, %s39_s22 }
  0x1a   :  { %p328_p10 = scmp.ne.s32.totalorder %s39_s22, %s327_s26  ;;  %p333_p12 = scmp.lt.s32.totalorder %s327_s26, %s327_s26 }
  0x1c   :  { %p334_p13 = por %p333_p12, %p332_p11 }
  0x1e   :  { %p335_p0 = pnand %p334_p13, %p328_p10 }
  0x20   :  { %338 = shalt.err (!%p335_p0)
}
  0x21   :  { %44 = dma.hbm_to_vmem [thread:$0]  %s407_s2, 640, %s39_s22, [#allocation6], %s366_s15, %s366_s15, %s367_s16  }
  0x22   :  { %359 = dma.done.wait [#allocation3], 128  }
  0x23   :  { %360 = vsyncadd [#allocation3], 4294967168 }
  0x24   :  { %361 = dma.done.wait [#allocation6], 1024  }
  0x25   :  { %362 = vsyncadd [#allocation6], 4294966272  ;;  %v370_v0 = vmov 0.0   ;;  %vm371_vm0 = vmmov 0   ;;  %vm62_vm1 = vcmask 1040384   ;;  %v56_v2 = vld [vmem:[#allocation5 + $0x8] sm:$0xff] }
  0x26   :  { %249 = vmatprep.subr.mxu0 %v370_v0  ;;  %255 = vmatprep.mubr.msk.f32.mxu0 %vm371_vm0, %v370_v0  ;;  %v57_v1 = vld [vmem:[#allocation5 + $0x10] sm:$0x1]  ;;  %v140_v3 = vld [vmem:[#allocation7 + $0x20] sm:$0x1]  ;;  %v55_v5 = vld [vmem:[#allocation5] sm:$0xff]  ;;  %vm58_vm2 = vcmask 138240  }
  0x27   :  { %258 = vmatprep.subr.mxu1 %v370_v0  ;;  %268 = vmatprep.mubr.msk.f32.mxu1 %vm371_vm0, %v370_v0  ;;  %v139_v4 = vld [vmem:[#allocation7 + $0x18] sm:$0xff]  ;;  %v54_v6 = vld [vmem:[#allocation2] sm:$0xff]  ;;  %v138_v7 = vld [vmem:[#allocation7 + $0x10] sm:$0xff]  ;;  %vm141_vm3 = vcmask 269312   ;;  %s372_s0 = smov [#allocation8]  }
  0x28   :  { %250 = vmatpush3.msk.msra.mxu0 %vm62_vm1, %v57_v1  ;;  %259 = vmatpush3.msk.msra.mxu1 %vm62_vm1, %v140_v3  ;;  %v137_v8 = vld [vmem:[#allocation7 + $0x8] sm:$0xff]  ;;  %v136_v9 = vld [vmem:[#allocation7] sm:$0xff]  ;;  %s225_s2 = sshll.u32 %s372_s0, 4  ;;  %s226_s2 = int_to_ptr.vmem [resolvable:$true] %s225_s2 }
  0x29   :  { %251 = vmatprep.subr.mxu0 %v370_v0  ;;  %260 = vmatprep.subr.mxu1 %v370_v0  ;;  %s339_s28 = scalar_lea.vmem %s226_s2, 128  ;;  %p344_p2 = scmp.lt.s32.totalorder %s226_s2, %s226_s2 }
  0x2a   :  { %252 = vmatpush3.msra.mxu0 %v56_v2  ;;  %261 = vmatpush3.msra.mxu1 %v139_v4  ;;  %p340_p1 = scmp.ne.s32.totalorder %s226_s2, %s339_s28  ;;  %p345_p3 = scmp.lt.s32.totalorder %s339_s28, %s339_s28 }
  0x2b   :  { %253 = vmatprep.subr.mxu0 %v370_v0  ;;  %262 = vmatprep.subr.mxu1 %v370_v0 }
  0x2c   :  { %254 = vmatpush3.msra.mxu0 %v55_v5  ;;  %263 = vmatpush3.msra.mxu1 %v138_v7  ;;  %p346_p4 = por %p345_p3, %p344_p2 }
  0x2d   :  { %256 = vmatmul.mubr.msk.f32.vlgmr.msra.gmra.mxu0 %vm58_vm2, %v54_v6  ;;  %264 = vmatprep.subr.mxu1 %v370_v0 }
  0x2e   :  { %265 = vmatpush3.msra.mxu1 %v137_v8  ;;  %p347_p5 = pnand %p346_p4, %p340_p1 }
  0x2f   :  { %266 = vmatprep.subr.mxu1 %v370_v0 }
  0x30   :  { %267 = vmatpush3.msra.mxu1 %v136_v9 }
  0xed   :  { %v132_v10 = vpop.f32.mrf.mxu0 }
  0xee   :  { %269 = vmatmul.mubr.msk.f32.vlgmr.msra.gmra.mxu1 %vm141_vm3, %v132_v10 }
  0xef   :  { %v257_v11 = vpop.f32.mrf.mxu0 }
 0x1ae   :  { %v214_v12 = vpop.f32.mrf.mxu1 }
 0x1af   :  { %218 = vst [vmem:[#allocation8] sm:$0xff] %v214_v12 }
 0x1b0   :  { %v270_v13 = vpop.f32.mrf.mxu1 }
 0x1b1   :  { %350 = shalt.err (!%p347_p5)
}
 0x1b2   :  { %228 = dma.vmem_to_hbm [thread:$0]  %s226_s2, 128, %s408_s3, [#allocation4]  }
 0x1b3   :  { %363 = dma.done.wait [#allocation4], 128  }
 0x1b4   :  { %364 = vsyncadd [#allocation4], 4294967168 }
 0x1b5   :  { %232 = vsyncpa [#allocation3], 1 }
 0x1b6   :  { %233 = vsyncpa [#allocation6], 1 }
 0x1b7   :  { %234 = vsyncpa [#allocation4], 1 }

</bundles_post_ra>
